<compile_context>
chip_gen: v6e
topology: v6e:2x2x1
jax: 0.10.0
libtpu: 0.0.40
codegen_flags: <defaults>
</compile_context>

<pallas_src>
import functools

import jax
import jax.numpy as jnp
from jax.experimental import pallas as pl
from jax.experimental.pallas import tpu as pltpu


def _attn_kernel(full_ref, last_ref, w1t_ref, b1_ref, w2t_ref, b2_ref,
                 v_ref, bv_ref, out_ref):
    # full_ref: (BB, T, D), last_ref: (BB, D), w1t/w2t: (D, D) pre-transposed,
    # b1/b2: (1, D), v: (1, D), bv: SMEM (1,), out_ref: (BB, D)
    BB, T, D = full_ref.shape
    full = full_ref[...]                                     # (BB, T, D)

    # W1 applied to the whole batch group at once: one (BB, D) @ (D, D) matmul.
    h1 = jnp.dot(last_ref[...], w1t_ref[...],
                 preferred_element_type=jnp.float32) + b1_ref[...]        # (BB, D)

    # W2 applied to all BB*T rows at once. T is a multiple of 8 sublanes, so
    # the (BB, T, D) -> (BB*T, D) reshape is layout-free.
    full2d = full.reshape(BB * T, D)
    h2 = jnp.dot(full2d, w2t_ref[...],
                 preferred_element_type=jnp.float32) + b2_ref[...]        # (BB*T, D)

    h = jnp.tanh(h2.reshape(BB, T, D) + h1[:, None, :])                   # (BB, T, D)

    # Score: VPU multiply + cross-lane (XLU) reduce instead of an N=1 matmul.
    v_row = v_ref[...].astype(jnp.float32)                                # (1, D)
    score = jnp.sum(h * v_row[None, :, :], axis=-1, keepdims=True)        # (BB, T, 1)
    score = score + bv_ref[0]                                             # scalar from SMEM

    # Softmax over T (PyTorch dim=1), in f32.
    m = jnp.max(score, axis=1, keepdims=True)                             # (BB, 1, 1)
    e = jnp.exp(score - m)
    w = e * pl.reciprocal(jnp.sum(e, axis=1, keepdims=True), approx=False)

    ctx = jnp.sum(w * full, axis=1)                                       # (BB, D) f32
    out_ref[...] = ctx.astype(out_ref.dtype)


def attention_forward(full, last, w1, b1, w2, b2, v, bv, *, block_b=None):
    """full: (B, T, D), last: (B, 1, D). Weights follow PyTorch Linear layout:
    w1, w2: (D, D) (out, in); b1, b2: (D,); v: (1, D); bv: (1,)."""
    B, T, D = full.shape

    if block_b is None:
        # Aim for block_b*T >= 256 rows into the batched W2 matmul where the
        # batch allows it; block_b must be a multiple of 8 (sublane tiling).
        bb = (max(256 // max(T, 1), 1) + 7) // 8 * 8
        block_b = min(max(bb, 8), (B + 7) // 8 * 8)
    block_b = max(8, (block_b + 7) // 8 * 8)

    # Pad batch so it divides evenly into groups (padded rows are dropped).
    Bp = (B + block_b - 1) // block_b * block_b
    if Bp != B:
        pad = Bp - B
        full = jnp.pad(full, ((0, pad), (0, 0), (0, 0)))
        last = jnp.pad(last, ((0, pad), (0, 0), (0, 0)))

    # Glue: pre-transpose weights / reshape biases so the kernel does pure matmuls.
    w1t = jnp.transpose(w1)                  # (D, D)
    w2t = jnp.transpose(w2)                  # (D, D)
    b1_2d = b1.reshape(1, D)
    b2_2d = b2.reshape(1, D)
    last2d = last.reshape(Bp, D)
    bv_1d = bv.reshape(1)

    grid = (Bp // block_b,)

    grid_spec = pltpu.PrefetchScalarGridSpec(
        num_scalar_prefetch=0,
        grid=grid,
        in_specs=[
            pl.BlockSpec((block_b, T, D), lambda i: (i, 0, 0)),   # full group
            pl.BlockSpec((block_b, D), lambda i: (i, 0)),         # last group
            pl.BlockSpec((D, D), lambda i: (0, 0)),               # W1^T (resident)
            pl.BlockSpec((1, D), lambda i: (0, 0)),               # b1
            pl.BlockSpec((D, D), lambda i: (0, 0)),               # W2^T (resident)
            pl.BlockSpec((1, D), lambda i: (0, 0)),               # b2
            pl.BlockSpec((1, D), lambda i: (0, 0)),               # V row
            pl.BlockSpec(memory_space=pltpu.MemorySpace.SMEM),    # bv scalar
        ],
        out_specs=pl.BlockSpec((block_b, D), lambda i: (i, 0)),
    )

    out = pl.pallas_call(
        _attn_kernel,
        out_shape=jax.ShapeDtypeStruct((Bp, D), full.dtype),
        grid_spec=grid_spec,
        compiler_params=pltpu.CompilerParams(
            dimension_semantics=("parallel",)),
    )(full, last2d, w1t, b1_2d, w2t, b2_2d, v, bv_1d)

    return out[:B]


def attention_reference(full, last, w1, b1, w2, b2, v, bv):
    """Pure-JAX reference mirroring the PyTorch forward."""
    h1 = jnp.einsum("bsd,ed->bse", last, w1) + b1       # (B, 1, D)
    h2 = jnp.einsum("btd,ed->bte", full, w2) + b2       # (B, T, D)
    h = jnp.tanh(h1 + h2)
    score = jnp.einsum("btd,od->bto", h, v) + bv        # (B, T, 1)
    w = jax.nn.softmax(score, axis=1)
    return jnp.sum(w * full, axis=1)                    # (B, D)


if __name__ == "__main__":
    B, T, D = 16, 8, 32
    key = jax.random.PRNGKey(0)
    k_full, k_last, k_w1, k_b1, k_w2, k_b2, k_v, k_bv = jax.random.split(key, 8)

    full = jax.random.normal(k_full, (B, T, D), dtype=jnp.float32)
    last = jax.random.normal(k_last, (B, 1, D), dtype=jnp.float32)

    # PyTorch Linear shapes: weight (out, in), bias (out,)
    w1 = 0.1 * jax.random.normal(k_w1, (D, D), dtype=jnp.float32)
    b1 = 0.1 * jax.random.normal(k_b1, (D,), dtype=jnp.float32)
    w2 = 0.1 * jax.random.normal(k_w2, (D, D), dtype=jnp.float32)
    b2 = 0.1 * jax.random.normal(k_b2, (D,), dtype=jnp.float32)
    v = 0.1 * jax.random.normal(k_v, (1, D), dtype=jnp.float32)
    bv = 0.1 * jax.random.normal(k_bv, (1,), dtype=jnp.float32)

    # block_b=8 -> grid of 2 batch groups (keeps both v7x TensorCores busy).
    out = attention_forward(full, last, w1, b1, w2, b2, v, bv, block_b=8)
    out = jax.block_until_ready(out)

    ref = attention_reference(full, last, w1, b1, w2, b2, v, bv)
    assert out.shape == (B, D)
    assert jnp.allclose(out, ref, atol=1e-4, rtol=1e-4), "mismatch vs reference"

    print("KERNEL_OK")
</pallas_src>

<mosaic_0001>
module attributes {stable_mosaic.version = 11 : i64} {
  func.func @_attn_kernel(%arg0: i32, %arg1: memref<8x8x32xf32, #tpu.memory_space<vmem>>, %arg2: memref<8x32xf32, #tpu.memory_space<vmem>>, %arg3: memref<32x32xf32, #tpu.memory_space<vmem>>, %arg4: memref<1x32xf32, #tpu.memory_space<vmem>>, %arg5: memref<32x32xf32, #tpu.memory_space<vmem>>, %arg6: memref<1x32xf32, #tpu.memory_space<vmem>>, %arg7: memref<1x32xf32, #tpu.memory_space<vmem>>, %arg8: memref<1xf32, #tpu.memory_space<smem>>, %arg9: memref<8x32xf32, #tpu.memory_space<vmem>>) attributes {dimension_semantics = [#tpu.dimension_semantics<parallel>], iteration_bounds = array<i64: 2>, scalar_prefetch = 0 : i64, scratch_operands = 0 : i64, tpu.core_type = #tpu.core_type<tc>, window_params = [{transform_indices = @transform_0, window_bounds = array<i64: 8, 8, 32>}, {transform_indices = @transform_1, window_bounds = array<i64: 8, 32>}, {pipeline_mode = #tpu.pipeline_mode<synchronous>, transform_indices = @transform_2, window_bounds = array<i64: 32, 32>}, {pipeline_mode = #tpu.pipeline_mode<synchronous>, transform_indices = @transform_3, window_bounds = array<i64: 1, 32>}, {pipeline_mode = #tpu.pipeline_mode<synchronous>, transform_indices = @transform_4, window_bounds = array<i64: 32, 32>}, {pipeline_mode = #tpu.pipeline_mode<synchronous>, transform_indices = @transform_5, window_bounds = array<i64: 1, 32>}, {pipeline_mode = #tpu.pipeline_mode<synchronous>, transform_indices = @transform_6, window_bounds = array<i64: 1, 32>}, {transform_indices = @transform_7, window_bounds = array<i64: 1>}, {transform_indices = @transform_8, window_bounds = array<i64: 8, 32>}]} {
    %c0 = arith.constant 0 : index
    %c0_0 = arith.constant 0 : index
    %c0_1 = arith.constant 0 : index
    %0 = vector.load %arg1[%c0, %c0_0, %c0_1] : memref<8x8x32xf32, #tpu.memory_space<vmem>>, vector<8x8x32xf32>
    %c0_2 = arith.constant 0 : index
    %c0_3 = arith.constant 0 : index
    %1 = vector.load %arg2[%c0_2, %c0_3] : memref<8x32xf32, #tpu.memory_space<vmem>>, vector<8x32xf32>
    %c0_4 = arith.constant 0 : index
    %c0_5 = arith.constant 0 : index
    %2 = vector.load %arg3[%c0_4, %c0_5] : memref<32x32xf32, #tpu.memory_space<vmem>>, vector<32x32xf32>
    %cst = arith.constant dense<0.000000e+00> : vector<8x32xf32>
    %3 = tpu.matmul %1, %2, %cst {dimension_numbers = #tpu.dot_dimension_numbers<[1], [0], [0], [1], [0, 0, 1, 1], [], []>} : vector<8x32xf32>, vector<32x32xf32>, vector<8x32xf32> -> vector<8x32xf32>
    %c0_6 = arith.constant 0 : index
    %c0_7 = arith.constant 0 : index
    %4 = vector.load %arg4[%c0_6, %c0_7] : memref<1x32xf32, #tpu.memory_space<vmem>>, vector<1x32xf32>
    %5 = vector.broadcast %4 : vector<1x32xf32> to vector<8x32xf32>
    %6 = arith.addf %3, %5 : vector<8x32xf32>
    %7 = vector.shape_cast %0 : vector<8x8x32xf32> to vector<64x32xf32>
    %c0_8 = arith.constant 0 : index
    %c0_9 = arith.constant 0 : index
    %8 = vector.load %arg5[%c0_8, %c0_9] : memref<32x32xf32, #tpu.memory_space<vmem>>, vector<32x32xf32>
    %cst_10 = arith.constant dense<0.000000e+00> : vector<64x32xf32>
    %9 = tpu.matmul %7, %8, %cst_10 {dimension_numbers = #tpu.dot_dimension_numbers<[1], [0], [0], [1], [0, 0, 1, 1], [], []>} : vector<64x32xf32>, vector<32x32xf32>, vector<64x32xf32> -> vector<64x32xf32>
    %c0_11 = arith.constant 0 : index
    %c0_12 = arith.constant 0 : index
    %10 = vector.load %arg6[%c0_11, %c0_12] : memref<1x32xf32, #tpu.memory_space<vmem>>, vector<1x32xf32>
    %11 = vector.broadcast %10 : vector<1x32xf32> to vector<64x32xf32>
    %12 = arith.addf %9, %11 : vector<64x32xf32>
    %13 = vector.shape_cast %12 : vector<64x32xf32> to vector<8x8x32xf32>
    %14 = vector.shape_cast %6 : vector<8x32xf32> to vector<8x1x32xf32>
    %15 = vector.broadcast %14 : vector<8x1x32xf32> to vector<8x8x32xf32>
    %16 = arith.addf %13, %15 : vector<8x8x32xf32>
    %17 = math.tanh %16 : vector<8x8x32xf32>
    %c0_13 = arith.constant 0 : index
    %c0_14 = arith.constant 0 : index
    %18 = vector.load %arg7[%c0_13, %c0_14] : memref<1x32xf32, #tpu.memory_space<vmem>>, vector<1x32xf32>
    %19 = vector.shape_cast %18 : vector<1x32xf32> to vector<1x1x32xf32>
    %20 = vector.broadcast %19 : vector<1x1x32xf32> to vector<8x8x32xf32>
    %21 = arith.mulf %17, %20 : vector<8x8x32xf32>
    %cst_15 = arith.constant dense<0.000000e+00> : vector<8x8xf32>
    %22 = vector.multi_reduction <add>, %21, %cst_15 [2] : vector<8x8x32xf32> to vector<8x8xf32>
    %23 = vector.shape_cast %22 : vector<8x8xf32> to vector<8x8x1xf32>
    %c0_16 = arith.constant 0 : index
    %24 = memref.load %arg8[%c0_16] : memref<1xf32, #tpu.memory_space<smem>>
    %25 = vector.broadcast %24 : f32 to vector<8x8x1xf32>
    %26 = arith.addf %23, %25 : vector<8x8x1xf32>
    %cst_17 = arith.constant dense<0xFF800000> : vector<8x1xf32>
    %27 = vector.multi_reduction <maximumf>, %26, %cst_17 [1] : vector<8x8x1xf32> to vector<8x1xf32>
    %28 = vector.shape_cast %27 : vector<8x1xf32> to vector<8x1x1xf32>
    %29 = vector.broadcast %28 : vector<8x1x1xf32> to vector<8x8x1xf32>
    %30 = arith.subf %26, %29 : vector<8x8x1xf32>
    %31 = math.exp %30 : vector<8x8x1xf32>
    %cst_18 = arith.constant dense<0.000000e+00> : vector<8x1xf32>
    %32 = vector.multi_reduction <add>, %31, %cst_18 [1] : vector<8x8x1xf32> to vector<8x1xf32>
    %33 = vector.shape_cast %32 : vector<8x1xf32> to vector<8x1x1xf32>
    %34 = tpu.reciprocal %33 : vector<8x1x1xf32> -> vector<8x1x1xf32>
    %35 = vector.broadcast %34 : vector<8x1x1xf32> to vector<8x8x1xf32>
    %36 = arith.mulf %31, %35 : vector<8x8x1xf32>
    %37 = vector.broadcast %36 : vector<8x8x1xf32> to vector<8x8x32xf32>
    %38 = arith.mulf %37, %0 : vector<8x8x32xf32>
    %cst_19 = arith.constant dense<0.000000e+00> : vector<8x32xf32>
    %39 = vector.multi_reduction <add>, %38, %cst_19 [1] : vector<8x8x32xf32> to vector<8x32xf32>
    %c0_20 = arith.constant 0 : index
    %c0_21 = arith.constant 0 : index
    %40 = vector.load %arg9[%c0_20, %c0_21] : memref<8x32xf32, #tpu.memory_space<vmem>>, vector<8x32xf32>
    tpu.vector_store %arg9[%c0_20, %c0_21], %39 {strides = array<i32>} : memref<8x32xf32, #tpu.memory_space<vmem>>, vector<8x32xf32>,
    return
  }
  func.func @transform_0(%arg0: i32) -> (i32, i32, i32) {
    %c0_i32 = arith.constant 0 : i32
    %c0_i32_0 = arith.constant 0 : i32
    %c0_i32_1 = arith.constant 0 : i32
    return %arg0, %c0_i32, %c0_i32_0 : i32, i32, i32
  }
  func.func @transform_1(%arg0: i32) -> (i32, i32) {
    %c0_i32 = arith.constant 0 : i32
    %c0_i32_0 = arith.constant 0 : i32
    return %arg0, %c0_i32 : i32, i32
  }
  func.func @transform_2(%arg0: i32) -> (i32, i32) {
    %c0_i32 = arith.constant 0 : i32
    %c0_i32_0 = arith.constant 0 : i32
    %c0_i32_1 = arith.constant 0 : i32
    return %c0_i32, %c0_i32_0 : i32, i32
  }
  func.func @transform_3(%arg0: i32) -> (i32, i32) {
    %c0_i32 = arith.constant 0 : i32
    %c0_i32_0 = arith.constant 0 : i32
    %c0_i32_1 = arith.constant 0 : i32
    return %c0_i32, %c0_i32_0 : i32, i32
  }
  func.func @transform_4(%arg0: i32) -> (i32, i32) {
    %c0_i32 = arith.constant 0 : i32
    %c0_i32_0 = arith.constant 0 : i32
    %c0_i32_1 = arith.constant 0 : i32
    return %c0_i32, %c0_i32_0 : i32, i32
  }
  func.func @transform_5(%arg0: i32) -> (i32, i32) {
    %c0_i32 = arith.constant 0 : i32
    %c0_i32_0 = arith.constant 0 : i32
    %c0_i32_1 = arith.constant 0 : i32
    return %c0_i32, %c0_i32_0 : i32, i32
  }
  func.func @transform_6(%arg0: i32) -> (i32, i32) {
    %c0_i32 = arith.constant 0 : i32
    %c0_i32_0 = arith.constant 0 : i32
    %c0_i32_1 = arith.constant 0 : i32
    return %c0_i32, %c0_i32_0 : i32, i32
  }
  func.func @transform_7(%arg0: i32) -> i32 {
    %c0_i32 = arith.constant 0 : i32
    %c0_i32_0 = arith.constant 0 : i32
    return %c0_i32 : i32
  }
  func.func @transform_8(%arg0: i32) -> (i32, i32) {
    %c0_i32 = arith.constant 0 : i32
    %c0_i32_0 = arith.constant 0 : i32
    return %arg0, %c0_i32 : i32, i32
  }
}

</mosaic_0001>

<bundles_post_ra>
// kernel: tpu_custom_call.1
= control target key start
LH: loop header
LB: loop body
LE: loop exit
PB: predicated region body
PF: predicated region fallthrough
CT: control target
= control target key end

     0   :  { %s1949_s0 = inlined_call_operand.hbm [shape: f32[16,8,32], index: 0, kind: input, shape index: {}]   ;;  %s1950_s1 = inlined_call_operand.hbm [shape: f32[16,32], index: 1, kind: input, shape index: {}]   ;;  %s1951_s2 = inlined_call_operand.hbm [shape: f32[32,32], index: 2, kind: input, shape index: {}]   ;;  %s1952_s3 = inlined_call_operand.vmem [shape: f32[1,32], index: 3, kind: input, shape index: {}]   ;;  %s1953_s4 = inlined_call_operand.hbm [shape: f32[32,32], index: 4, kind: input, shape index: {}]   ;;  %s1954_s5 = inlined_call_operand.vmem [shape: f32[1,32], index: 5, kind: input, shape index: {}]   ;;  %s1955_s6 = inlined_call_operand.vmem [shape: f32[1,32], index: 6, kind: input, shape index: {}]   ;;  %s1956_s7 = inlined_call_operand.<no memory space> [shape: f32[1], index: 7, kind: input, shape index: {}]   ;;  %s1957_s8 = inlined_call_operand.hbm [shape: f32[16,32], index: 8, kind: output, shape index: {}]  }
   0x1   :  { %1965 = sst [smem:[#allocation19_spill]] %s1949_s0 }
   0x2   :  { %1966 = sst [smem:[#allocation20_spill]] %s1951_s2 }
   0x3   :  { %1967 = sst [smem:[#allocation21_spill]] %s1953_s4 }
   0x4   :  { %13 = sst [smem:[#allocation2]] %s1956_s7 }
   0x5   :  { %14 = vsyncpa [#allocation4], 0 }
   0x6   :  { %16 = vsyncpa [#allocation4 + $0x1], 0 }
   0x7   :  { %17 = vsyncpa [#allocation7], 0 }
   0x8   :  { %19 = vsyncpa [#allocation7 + $0x1], 0 }
   0x9   :  { %20 = vsyncpa [#allocation10], 0 }
   0xa   :  { %21 = vsyncpa [#allocation5], 0 }
   0xb   :  { %23 = vsyncpa [#allocation5 + $0x1], 0  ;;  %s1589_s29 = smov 0   ;;  %s1591_s30 = smov 0  }
   0xc   :  { %s1593_s9 = smov 0   ;;  %s1595_s10 = smov 0  }
   0xd LB: > { %1968 = sst [smem:[#allocation17_spill]] %s1525_s9  ;;  %s1610_s7 = sadd.s32 4294967295, %s1529_s10   ;;  %s1529_s10 = sphi %s1595_s10, %s1996_s10   ;;  %s1525_s9 = sphi %s1593_s9, %s1993_s9   ;;  %s1521_s30 = sphi %s1591_s30, %s1995_s30   ;;  %s1517_s29 = sphi %s1589_s29, %s1994_s29  }
   0xe   : > { %s1131_s11 = sadd.s32 4294967294, %s1529_s10   ;;  %p49_p0 = scmp.ne.s32.totalorder %s1521_s30, %s1517_s29 }
   0xf   : > { %p1960_p1 = scmp.eq.s32.totalorder %s1610_s7, 0  ;;  %p225_p2 = scmp.eq.s32.totalorder %s1610_s7, 1 }
  0x10   : > { %p231_p3 = scmp.eq.s32.totalorder %s1131_s11, 1  ;;  %p1132_p5 = scmp.ge.s32.totalorder %s1529_s10, 1 }
  0x11   : > { %p1619_p4 = por %p1960_p1, %p49_p0  ;;  %p238_p7 = scmp.lt.s32.totalorder %s1529_s10, 3 }
  0x12   : > { %p1624_p6 = por %p231_p3, %p49_p0  ;;  %s1531_s15 = smov [#allocation8]  }
  0x13   : > { %s1969_s12 = scalar_select %p1619_p4, 1, 0 }
  0x14   : > { %s1970_s13 = scalar_select %p1624_p6, 1, 0 }
  0x15   : > { %p1629_p8 = pnand %p1132_p5, %p238_p7  ;;  %s250_s16 = sshll.u32 %s1531_s15, 4  ;;  %s251_s16 = int_to_ptr.vmem [resolvable:$true] %s250_s16 }
  0x16   : > { %s1532_s18 = smov [#allocation9]   ;;  %s1356_s20 = scalar_lea.vmem %s251_s16, 512 }
  0x17   : > { %s1971_s14 = scalar_select %p1629_p8, 1, 0 }
  0x18   : > { %p1234_p9 = pneg %p1629_p8  ;;  %s266_s19 = sshll.u32 %s1532_s18, 4  ;;  %s267_s19 = int_to_ptr.vmem [resolvable:$true] %s266_s19 }
  0x19   : > { %p1357_p13 = scmp.ne.s32.totalorder %s251_s16, %s1356_s20  ;;  %p1364_p5 = scmp.lt.s32.totalorder %s251_s16, %s251_s16 }
  0x1a   : > { %p1638_p11 = pnand %p1234_p9, %p1960_p1  ;;  %p1365_p7 = scmp.lt.s32.totalorder %s1356_s20, %s1356_s20 }
  0x1c   : > { %p1347_p12 = pneg %p1638_p11  ;;  %p1366_p10 = por %p1365_p7, %p1364_p5 }
  0x1e   : > { %p1359_p0 = pnand %p1357_p13, %p1347_p12 }
  0x20   : > { %p1360_p3 = pneg %p1359_p0 }
  0x22   : > { %p1367_p9 = pnand %p1366_p10, %p1360_p3 }
  0x24   : > { %1370 = shalt.err (!%p1367_p9)
}
  0x25   : > { %s1958_s21 = smov 128   ;;  %s1959_s22 = smov 8  }
  0x26   : > { %s1973_s2 = sld [smem:[#allocation20_spill]]  ;;  %s1382_s25 = scalar_lea.vmem %s267_s19, 512 }
  0x27   : > { %p1383_p13 = scmp.ne.s32.totalorder %s267_s19, %s1382_s25  ;;  %p1390_p10 = scmp.lt.s32.totalorder %s267_s19, %s267_s19 }
  0x28   : > { %p1391_p3 = scmp.lt.s32.totalorder %s1382_s25, %s1382_s25 }
  0x29   : > { %p1385_p0 = pnand %p1383_p13, %p1347_p12 }
  0x2a   : > { %p1392_p7 = por %p1391_p3, %p1390_p10 }
  0x2b   : > { %p1386_p5 = pneg %p1385_p0 }
  0x2c   : > { %1237 = dma.hbm_to_vmem [thread:$0]  (!%p1638_p11), %s1973_s2, 512, %s251_s16, [#allocation7], %s1958_s21, %s1958_s21, %s1959_s22  }
  0x2d   : > { %p1393_p9 = pnand %p1392_p7, %p1386_p5 }
  0x2f   : > { %1396 = shalt.err (!%p1393_p9)
}
  0x30   : > { %s1974_s4 = sld [smem:[#allocation21_spill]]  ;;  %s1667_s28 = sadd.s32 1, %s1529_s10  }
  0x31   : > { %s36_s11 = sadd.s32 1, %s1525_s9  ;;  %s33_s15 = ssub.s32 %s1529_s10, %s1667_s28 }
  0x32   : > { %p43_p12 = scmp.ne.s32.totalorder %s1525_s9, %s1521_s30  ;;  %p34_p13 = scmp.eq.s32.totalorder %s33_s15, 0 }
  0x33   : > { %p44_p0 = scmp.eq.s32.totalorder %s1529_s10, 0  ;;  %p1254_p10 = scmp.lt.s32.totalorder %s1529_s10, 2 }
  0x34   : > { %p1677_p5 = por %p225_p2, %p43_p12  ;;  %s1686_s18 = sand.u32 1, %s1525_s9  }
  0x35   : > { %s1683_s17 = scalar_select %p34_p13, %s1525_s9, %s36_s11  }
  0x36   : > { %1240 = dma.hbm_to_vmem [thread:$0]  (!%p1638_p11), %s1974_s4, 512, %s267_s19, [#allocation10], %s1958_s21, %s1958_s21, %s1959_s22  }
  0x37   : > { %s1975_s16 = scalar_select %p1677_p5, 1, 0 }
  0x38   : > { %1976 = sst [smem:[#allocation18_spill]] %s1683_s17  ;;  %p45_p3 = por %p44_p0, %p43_p12 }
  0x39   : > { %s1136_s19 = sshll.u32 %s1686_s18, 6  ;;  %s1163_s20 = sshll.u32 %s1529_s10, 10 }
  0x3a   : > { %s1977_s0 = sld [smem:[#allocation19_spill]]  ;;  %s293_s26 = scalar_lea.vmem [#allocation3], %s1136_s19 }
  0x3b   : > { %s300_s27 = sshll.u32 %s293_s26, 4  ;;  %p1697_p2 = pnand %p1254_p10, %p45_p3  ;;  %s1695_s27 = int_to_ptr.vmem [resolvable:$true] %s300_s27 }
  0x3c   : > { %s290_s22 = scalar_lea.sflag [#allocation4], %s1686_s18 }
  0x3d   : > { %p1399_p7 = pneg %p1697_p2 }
  0x40   : > { %s1693_s25 = scalar_lea.hbm %s1977_s0, %s1163_s20  ;;  %s1402_s23 = scalar_lea.hbm %s1977_s0, 2048 }
  0x41   : > { %s1397_s2 = scalar_lea.hbm %s1693_s25, 1024  ;;  %p1403_p13 = scmp.lt.s32.totalorder %s1693_s25, %s1977_s0 }
  0x42   : > { %p1398_p11 = scmp.ne.s32.totalorder %s1693_s25, %s1397_s2  ;;  %p1404_p0 = scmp.lt.s32.totalorder %s1402_s23, %s1397_s2 }
  0x44   : > { %p1400_p9 = pnand %p1399_p7, %p1398_p11  ;;  %p1405_p10 = por %p1404_p0, %p1403_p13 }
  0x46   : > { %p1401_p12 = pneg %p1400_p9 }
  0x48   : > { %p1406_p3 = pnand %p1405_p10, %p1401_p12 }
  0x4a   : > { %1409 = shalt.err (!%p1406_p3)
}
  0x4b   : > { %s1410_s15 = scalar_lea.vmem %s1695_s27, 1024  ;;  %s1535_s19 = smov [#allocation3]  }
  0x4c   : > { %p1411_p1 = scmp.ne.s32.totalorder %s1695_s27, %s1410_s15  ;;  %s1415_s20 = sshll.u32 %s1535_s19, 4  ;;  %s1416_s20 = int_to_ptr.vmem [resolvable:$false] %s1415_s20 }
  0x4d   : > { %s1417_s21 = scalar_lea.vmem %s1416_s20, 2048  ;;  %p1418_p6 = scmp.lt.s32.totalorder %s1695_s27, %s1416_s20 }
  0x4e   : > { %p1413_p11 = pnand %p1411_p1, %p1399_p7  ;;  %p1419_p5 = scmp.lt.s32.totalorder %s1417_s21, %s1410_s15 }
  0x50   : > { %p1414_p9 = pneg %p1413_p11  ;;  %p1420_p4 = por %p1419_p5, %p1418_p6 }
  0x52   : > { %p1421_p13 = pnand %p1420_p4, %p1414_p9 }
  0x54   : > { %1424 = shalt.err (!%p1421_p13)
}
  0x55   : > { %s1979_s2 = smov 8   ;;  %s1980_s23 = smov 128  }
  0x56   : > { %1244 = dma.hbm_to_vmem [thread:$0]  (!%p1697_p2), %s1693_s25, 1024, %s1695_s27, %s290_s22, %s1980_s23, %s1980_s23, %s1979_s2  }
  0x57   : > { %s1140_s24 = sshll.u32 %s1529_s10, 7  ;;  %s1981_s19 = sshll.u32 %s1686_s18, 3 }
  0x58   : > { %s1737_s15 = scalar_lea.hbm %s1950_s1, %s1140_s24  ;;  %s314_s20 = scalar_lea.vmem [#allocation6], %s1981_s19 }
  0x59   : > { %s321_s0 = sshll.u32 %s314_s20, 4  ;;  %s1982_s4 = sand.u32 1, %s1529_s10   ;;  %s322_s0 = int_to_ptr.vmem [resolvable:$true] %s321_s0 }
  0x5a   : > { %s311_s17 = scalar_lea.sflag [#allocation7], %s1982_s4  ;;  %s1425_s9 = scalar_lea.hbm %s1737_s15, 128 }
  0x5b   : > { %p1426_p1 = scmp.ne.s32.totalorder %s1737_s15, %s1425_s9  ;;  %s1430_s27 = scalar_lea.hbm %s1950_s1, 256 }
  0x5c   : > { %p1431_p5 = scmp.lt.s32.totalorder %s1737_s15, %s1950_s1  ;;  %p1432_p12 = scmp.lt.s32.totalorder %s1430_s27, %s1425_s9 }
  0x5d   : > { %p1428_p4 = pnand %p1426_p1, %p1399_p7 }
  0x5e   : > { %p1433_p0 = por %p1432_p12, %p1431_p5 }
  0x5f   : > { %p1429_p6 = pneg %p1428_p4 }
  0x61   : > { %p1434_p10 = pnand %p1433_p0, %p1429_p6 }
  0x63   : > { %1437 = shalt.err (!%p1434_p10)
}
  0x64   : > { %s1438_s23 = scalar_lea.vmem %s322_s0, 128  ;;  %s1536_s4 = smov [#allocation6]  }
  0x65   : > { %p1439_p3 = scmp.ne.s32.totalorder %s322_s0, %s1438_s23  ;;  %s1443_s24 = sshll.u32 %s1536_s4, 4  ;;  %s1444_s24 = int_to_ptr.vmem [resolvable:$false] %s1443_s24 }
  0x66   : > { %s1445_s26 = scalar_lea.vmem %s1444_s24, 256  ;;  %p1446_p13 = scmp.lt.s32.totalorder %s322_s0, %s1444_s24 }
  0x67   : > { %p1441_p11 = pnand %p1439_p3, %p1399_p7  ;;  %p1447_p1 = scmp.lt.s32.totalorder %s1445_s26, %s1438_s23 }
  0x69   : > { %p1442_p9 = pneg %p1441_p11  ;;  %p1448_p4 = por %p1447_p1, %p1446_p13 }
  0x6b   : > { %p1449_p8 = pnand %p1448_p4, %p1442_p9 }
  0x6d   : > { %1452 = shalt.err (!%p1449_p8)
}
  0x6e   : > { %1247 = dma.hbm_to_vmem [thread:$0]  (!%p1697_p2), %s1737_s15, 128, %s322_s0, %s311_s17  }
  0x6f   : > { %p1983_p6 = scmp.ne.s32.totalorder %s1971_s14, 0 }
  0x70   : > { %s1764_s9 = sand.u32 (!%p1983_p6), 1, %s1521_s30   ;;  %p1984_p7 = scmp.ne.s32.totalorder (!%p1983_p6), %s1969_s12, 0 }
  0x71   : > { %330 = sbr.rel (%p1983_p6) target bundleno = 606 (0x25e), region = 52  ;;  %s1142_s21 = sshll.u32 (!%p1983_p6), %s1764_s9, 6 }
  0x72   : > { %s333_s19 = scalar_lea.sflag (!%p1983_p6), [#allocation4], %s1764_s9  ;;  %s1768_s20 = scalar_lea.vmem (!%p1983_p6), [#allocation3], %s1142_s21 }
  0x76   : > { %1496 = dma.done.wait (%p1984_p7), %s333_s19, 1024  }
  0x77   : > { %1498 = vsyncadd (%p1984_p7), %s333_s19, 4294966272  ;;  %s341_s0 = sand.u32 1, %s1610_s7   ;;  %s1143_s14 = sshll.u32 %s1764_s9, 3 }
  0x78   : > { %s342_s17 = scalar_lea.sflag [#allocation7], %s341_s0  ;;  %s345_s11 = scalar_lea.vmem [#allocation6], %s1143_s14 }
  0x79   : > { %1500 = dma.done.wait (%p1984_p7), %s342_s17, 128  }
  0x7a   : > { %1502 = vsyncadd (%p1984_p7), %s342_s17, 4294967168  ;;  %p1985_p8 = scmp.eq.s32.totalorder %s1610_s7, 0 }
  0x7c   : > { %1504 = dma.done.wait (%p1985_p8), [#allocation7], 512   ;;  %p1986_p2 = pmov %p1985_p8 }
  0x7e   : > { %1506 = vsyncadd (%p1986_p2), [#allocation7], 4294966784  ;;  %p1987_p5 = pmov %p1986_p2 }
  0x7f   : > { %p1988_p12 = pmov %p1986_p2 }
  0x80   : > { %1508 = dma.done.wait (%p1987_p5), [#allocation10], 512  }
  0x81   : > { %1510 = vsyncadd (%p1988_p12), [#allocation10], 4294966784  ;;  %v1537_v0 = vmov 0.0   ;;  %vm1538_vm0 = vmmov 0   ;;  %v404_v1 = vld [vmem:[#allocation8 + $0x18] sm:$0xff]  ;;  %v403_v3 = vld [vmem:[#allocation8 + $0x10] sm:$0xff]  ;;  %v631_v20 = vlaneseq }
  0x82   : > { %1181 = vmatprep.subr.mxu0 %v1537_v0  ;;  %1189 = vmatprep.mubr.msk.f32.mxu0 %vm1538_vm0, %v1537_v0  ;;  %v489_v2 = vld [vmem:[#allocation9 + $0x18] sm:$0xff]  ;;  %v488_v4 = vld [vmem:[#allocation9 + $0x10] sm:$0xff]  ;;  %v402_v5 = vld [vmem:[#allocation8 + $0x8] sm:$0xff]  ;;  %vm412_vm1 = vcmask 261120   ;;  %v1539_v18 = vmov 1966171168  }
  0x83   : > { %1182 = vmatpush3.msra.mxu0 %v404_v1  ;;  %1212 = vmatprep.subr.mxu1 %v489_v2  ;;  %v487_v6 = vld [vmem:[#allocation9 + $0x8] sm:$0xff]  ;;  %v401_v7 = vld [vmem:[#allocation8] sm:$0xff]  ;;  %v400_v9 = vld [vmem:[%s345_s11] sm:$0xff]  ;;  %v629_v19 = vunpack.c.l.s4 %v1539_v18  ;;  %v632_v22 = vshrl.u32 %v631_v20, 7  ;;  %s771_s18 = sld [smem:[#allocation2]]  ;;  %vm989_vm2 = vcmask 1041409  }
  0x84   : > { %1183 = vmatprep.subr.mxu0 %v1537_v0  ;;  %1216 = vmatpush3.msra.mxu1 %v489_v2  ;;  %v486_v8 = vld [vmem:[#allocation9] sm:$0xff]  ;;  %v1794_v11 = vld [vmem:[%s1768_s20 + $0x18] sm:$0xff]  ;;  %v1798_v12 = vld [vmem:[%s1768_s20 + $0x20] sm:$0xff]  ;;  %vm991_vm3 = vcmask 1042434   ;;  %vm993_vm4 = vcmask 1043459   ;;  %vm995_vm5 = vcmask 1044484  }
  0x85   : > { %1184 = vmatpush3.msra.mxu0 %v403_v3  ;;  %1213 = vmatprep.subr.mxu1 %v488_v4  ;;  %v1791_v10 = vld [vmem:[%s1768_s20 + $0x10] sm:$0xff]  ;;  %v1803_v13 = vld [vmem:[%s1768_s20] sm:$0xff]  ;;  %v1810_v14 = vld [vmem:[%s1768_s20 + $0x28] sm:$0xff]  ;;  %v630_v21 = vunpack.c.0.s8 %v629_v19  ;;  %v678_v36 = vsub.s32 0, %v632_v22  ;;  %vm997_vm6 = vcmask 1045509   ;;  %vm999_vm7 = vcmask 1046534  }
  0x86   : > { %1185 = vmatprep.subr.mxu0 %v1537_v0  ;;  %1217 = vmatpush3.msra.mxu1 %v488_v4  ;;  %v1815_v15 = vld [vmem:[%s1768_s20 + $0x30] sm:$0xff]  ;;  %v1820_v16 = vld [vmem:[%s1768_s20 + $0x8] sm:$0xff]  ;;  %v1825_v17 = vld [vmem:[%s1768_s20 + $0x38] sm:$0xff]  ;;  %s1160_s23 = sshll.u32 %s1610_s7, 7  ;;  %s390_s4 = scalar_lea.vmem [#allocation11], %s1143_s14  ;;  %vm1001_vm8 = vcmask 1047559  }
  0x87   : > { %1186 = vmatpush3.msra.mxu0 %v402_v5  ;;  %1214 = vmatprep.subr.mxu1 %v487_v6  ;;  %v1147_v23 = vld [vmem:[%s1952_s3] ss:$0 sm:$0xff]  ;;  %v633_v24 = vsub.s32 %v630_v21, %v632_v22  ;;  %s1019_s24 = sshll.u32 %s390_s4, 4  ;;  %s1911_s19 = scalar_lea.hbm %s1957_s8, %s1160_s23  ;;  %s1020_s24 = int_to_ptr.vmem [resolvable:$true] %s1019_s24 }
  0x88   : > { %1187 = vmatprep.subr.mxu0 %v1537_v0  ;;  %1218 = vmatpush3.msra.mxu1 %v487_v6  ;;  %v1149_v31 = vld [vmem:[%s1954_s5] ss:$0 sm:$0xff]  ;;  %s1006_s20 = scalar_lea.sflag [#allocation5], %s1764_s9  ;;  %s1453_s0 = scalar_lea.vmem %s1020_s24, 128 }
  0x89   : > { %1188 = vmatpush3.msra.mxu0 %v401_v7  ;;  %1215 = vmatprep.subr.mxu1 %v486_v8  ;;  %v1158_v19 = vld [vmem:[%s1955_s6] ss:$0 sm:$0xff]  ;;  %p1454_p0 = scmp.ne.s32.totalorder %s1020_s24, %s1453_s0  ;;  %p1989_p10 = scmp.ne.s32.totalorder %s1975_s16, 0 }
  0x8a   : > { %1190 = vmatmul.mubr.msk.f32.vlgmr.msra.gmra.mxu0 %vm412_vm1, %v400_v9  ;;  %1192 = vmatprep.subr.mxu0 %v489_v2  ;;  %s1540_s7 = smov [#allocation11]  }
  0x8b   : > { %1219 = vmatpush3.msra.mxu1 %v486_v8  ;;  %1203 = vmatprep.mubr.msk.f32.mxu1 %vm412_vm1, %v1791_v10  ;;  %p1455_p3 = pnand %p1454_p0, %p1989_p10  ;;  %s1457_s14 = sshll.u32 %s1540_s7, 4  ;;  %s1458_s14 = int_to_ptr.vmem [resolvable:$false] %s1457_s14 }
  0x8c   : > { %1193 = vmatpush3.msra.mxu0 %v489_v2  ;;  %1204 = vmatmul.mubr.msk.f32.vlgmr.msra.gmra.mxu1 %vm412_vm1, %v1794_v11  ;;  %s1459_s17 = scalar_lea.vmem %s1458_s14, 256  ;;  %p1460_p9 = scmp.lt.s32.totalorder %s1020_s24, %s1458_s14 }
  0x8d   : > { %1194 = vmatprep.subr.mxu0 %v488_v4  ;;  %1206 = vmatprep.mubr.msk.f32.mxu1 %vm412_vm1, %v1798_v12  ;;  %p1456_p11 = pneg %p1455_p3  ;;  %p1461_p13 = scmp.lt.s32.totalorder %s1459_s17, %s1453_s0 }
  0x8e   : > { %1195 = vmatpush3.msra.mxu0 %v488_v4  ;;  %1200 = vmatprep.mubr.msk.f32.mxu0 %vm412_vm1, %v1803_v13 }
  0x8f   : > { %1196 = vmatprep.subr.mxu0 %v487_v6  ;;  %p1462_p1 = por %p1461_p13, %p1460_p9 }
  0x90   : > { %1197 = vmatpush3.msra.mxu0 %v487_v6  ;;  %1207 = vmatmul.mubr.msk.f32.gmra.mxu1 %vm412_vm1, %v1810_v14 }
  0x91   : > { %1198 = vmatprep.subr.mxu0 %v486_v8  ;;  %1209 = vmatprep.mubr.msk.f32.mxu1 %vm412_vm1, %v1815_v15  ;;  %p1463_p4 = pnand %p1462_p1, %p1456_p11 }
  0x92   : > { %1199 = vmatpush3.msra.mxu0 %v486_v8 }
  0x93   : > { %1201 = vmatmul.mubr.msk.f32.vlgmr.msra.gmra.mxu0 %vm412_vm1, %v1820_v16 }
  0x94   : > { %1210 = vmatmul.mubr.msk.f32.gmra.mxu1 %vm412_vm1, %v1825_v17 }
 0x14a   : > { %v482_v25 = vpop.f32.mrf.mxu0 }
 0x14b   : > { %v483_v26 = vadd.f32 %v1147_v23, %v482_v25 }
 0x14c   : > { %v1205_v27 = vpop.f32.mrf.mxu1  ;;  %v1191_v28 = vpop.f32.mrf.mxu0 }
 0x14d   : > { %v627_v29 = vcombine.high %v483_v26, %v483_v26  ;;  %v634_v30 = vrot.slane %v483_v26, %v633_v24  ;;  %v603_v42 = vadd.f32 %v1205_v27, %v1149_v31 }
 0x14e   : > { %v597_v32 = vpop.f32.mrf.mxu1 }
 0x14f   : > { %v641_v33 = vrot.slane %v627_v29, %v633_v24  ;;  %v642_v34 = vcombine.high %v634_v30, %v634_v30  ;;  %v650_v35 = vrot.slane %v634_v30, %v633_v24  ;;  %v598_v40 = vadd.f32 %v1149_v31, %v597_v32 }
 0x150   : > { %v1208_v37 = vpop.f32.mrf.mxu1 }
 0x151   : > { %v643_v38 = vcombine.high %v641_v33, %v641_v33  ;;  %v664_v39 = vrot.slane %v642_v34, %v633_v24  ;;  %v672_v41 = vcombine.high %v650_v35, %v650_v35  ;;  %v657_v44 = vrot.slane %v641_v33, %v633_v24 }
 0x152   : > { %v607_v43 = vpop.f32.mrf.mxu1  ;;  %v613_v47 = vadd.f32 %v1208_v37, %v1149_v31  ;;  %v679_v54 = vrot.slane %v650_v35, %v678_v36 }
 0x153   : > { %v674_v45 = vcombine.high %v664_v39, %v664_v39  ;;  %v687_v46 = vrot.slane %v672_v41, %v678_v36  ;;  %v671_v48 = vrot.slane %v643_v38, %v633_v24  ;;  %v1202_v49 = vpop.f32.mrf.mxu0  ;;  %v608_v50 = vadd.f32 %v1149_v31, %v607_v43 }
 0x154   : > { %v593_v51 = vadd.f32 %v1202_v49, %v1149_v31  ;;  %v683_v52 = vrot.slane %v664_v39, %v678_v36  ;;  %v1211_v53 = vpop.f32.mrf.mxu1  ;;  %v695_v58 = vrot.slane %v657_v44, %v678_v36  ;;  %v673_v63 = vcombine.high %v657_v44, %v657_v44 }
 0x155   : > { %v691_v55 = vrot.slane %v674_v45, %v678_v36  ;;  %v718_v56 = vadd.f32 %v687_v46, %v598_v40  ;;  %v699_v57 = vrot.slane %v671_v48, %v678_v36  ;;  %v587_v59 = vpop.f32.mrf.mxu0  ;;  %v623_v60 = vadd.f32 %v1211_v53, %v1149_v31 }
 0x156   : > { %v675_v61 = vcombine.high %v671_v48, %v671_v48  ;;  %v588_v62 = vadd.f32 %v1149_v31, %v587_v59  ;;  %v717_v2 = vadd.f32 %v683_v52, %v593_v51  ;;  %v617_v4 = vpop.f32.mrf.mxu1  ;;  %v720_v6 = vadd.f32 %v695_v58, %v608_v50 }
 0x157   : > { %v719_v0 = vadd.f32 %v691_v55, %v603_v42  ;;  %1297 = vtanh.f32 %v718_v56  ;;  %v721_v1 = vadd.f32 %v699_v57, %v613_v47  ;;  %v618_v8 = vadd.f32 %v1149_v31, %v617_v4 }
 0x158   : > { %v707_v3 = vrot.slane %v675_v61, %v678_v36  ;;  %v716_v5 = vadd.f32 %v679_v54, %v588_v62  ;;  %v703_v9 = vrot.slane %v673_v63, %v678_v36  ;;  %v772_v44 = vstv %s771_s18 }
 0x159   : > { %1299 = vtanh.f32 %v719_v0 }
 0x15a   : > { %1301 = vtanh.f32 %v721_v1  ;;  %v723_v7 = vadd.f32 %v707_v3, %v623_v60  ;;  %v722_v18 = vadd.f32 %v703_v9, %v618_v8 }
 0x15b   : > { %1303 = vtanh.f32 %v717_v2 }
 0x15c   : > { %1305 = vtanh.f32 %v716_v5 }
 0x15d   : > { %1307 = vtanh.f32 %v720_v6 }
 0x15e   : > { %1309 = vtanh.f32 %v723_v7 }
 0x15f   : > { %1311 = vtanh.f32 %v722_v18 }
 0x164   : > { %v1298_v20 = vpop.eup %1297 }
 0x165   : > { %v741_v21 = vmul.f32 %v1298_v20, %v1158_v19 }
 0x166   : > { %v1300_v22 = vpop.eup %1299 }
 0x167   : > { %v1302_v23 = vpop.eup %1301  ;;  %v753_v24 = vsel %vm412_vm1, %v741_v21, 0.0  ;;  %v742_v25 = vmul.f32 %v1300_v22, %v1158_v19 }
 0x168   : > { %v1304_v26 = vpop.eup %1303  ;;  %754 = vadd.xlane.f32.xlu1 %v753_v24  ;;  %v744_v33 = vmul.f32 %v1302_v23, %v1158_v19 }
 0x169   : > { %v740_v27 = vmul.f32 %v1304_v26, %v1158_v19  ;;  %v1306_v28 = vpop.eup %1305  ;;  %v756_v31 = vsel %vm412_vm1, %v742_v25, 0.0 }
 0x16a   : > { %v1308_v29 = vpop.eup %1307  ;;  %v739_v32 = vmul.f32 %v1306_v28, %v1158_v19  ;;  %v762_v36 = vsel %vm412_vm1, %v744_v33, 0.0 }
 0x16b   : > { %v750_v30 = vsel %vm412_vm1, %v740_v27, 0.0  ;;  %v1310_v34 = vpop.eup %1309  ;;  %v743_v37 = vmul.f32 %v1308_v29, %v1158_v19 }
 0x16c   : > { %751 = vadd.xlane.f32.xlu0 %v750_v30  ;;  %757 = vadd.xlane.f32.xlu1 %v756_v31  ;;  %v747_v35 = vsel %vm412_vm1, %v739_v32, 0.0  ;;  %v746_v38 = vmul.f32 %v1310_v34, %v1158_v19  ;;  %v1312_v39 = vpop.eup %1311 }
 0x16d   : > { %v759_v40 = vsel %vm412_vm1, %v743_v37, 0.0  ;;  %v745_v42 = vmul.f32 %v1312_v39, %v1158_v19 }
 0x16e   : > { %v768_v41 = vsel %vm412_vm1, %v746_v38, 0.0 }
 0x16f   : > { %v765_v43 = vsel %vm412_vm1, %v745_v42, 0.0 }
 0x170   : > { %748 = vadd.xlane.f32.xlu0 %v747_v35  ;;  %763 = vadd.xlane.f32.xlu1 %v762_v36 }
 0x174   : > { %760 = vadd.xlane.f32.xlu0 %v759_v40  ;;  %769 = vadd.xlane.f32.xlu1 %v768_v41 }
 0x178   : > { %766 = vadd.xlane.f32.xlu0 %v765_v43 }
 0x1f1   : > { %v755_v45 = vpop.xlane.xlu1 %754 }
 0x1f2   : > { %v775_v46 = vadd.f32 %v772_v44, %v755_v45 }
 0x1f4   : > { %v793_v47 = vrot.slane %v775_v46, 4 }
 0x1f5   : > { %v752_v48 = vpop.xlane.xlu0 %751  ;;  %v758_v49 = vpop.xlane.xlu1 %757 }
 0x1f6   : > { %v794_v50 = vmax.f32 %v775_v46, %v793_v47  ;;  %v774_v51 = vadd.f32 %v772_v44, %v752_v48  ;;  %v776_v52 = vadd.f32 %v772_v44, %v758_v49 }
 0x1f8   : > { %v795_v53 = vrot.slane %v794_v50, 2  ;;  %v787_v54 = vrot.slane %v774_v51, 4  ;;  %v799_v55 = vrot.slane %v776_v52, 4 }
 0x1f9   : > { %v749_v56 = vpop.xlane.xlu0 %748  ;;  %v764_v57 = vpop.xlane.xlu1 %763 }
 0x1fa   : > { %v796_v58 = vmax.f32 %v794_v50, %v795_v53  ;;  %v788_v59 = vmax.f32 %v774_v51, %v787_v54  ;;  %v800_v60 = vmax.f32 %v776_v52, %v799_v55  ;;  %v773_v61 = vadd.f32 %v772_v44, %v749_v56 }
 0x1fb   : > { %v778_v62 = vadd.f32 %v772_v44, %v764_v57 }
 0x1fc   : > { %v797_v63 = vrot.slane %v796_v58, 1  ;;  %v789_v0 = vrot.slane %v788_v59, 2  ;;  %v801_v1 = vrot.slane %v800_v60, 2  ;;  %v781_v2 = vrot.slane %v773_v61, 4 }
 0x1fd   : > { %v811_v3 = vrot.slane %v778_v62, 4  ;;  %v761_v4 = vpop.xlane.xlu0 %760  ;;  %v770_v5 = vpop.xlane.xlu1 %769 }
 0x1fe   : > { %v798_v6 = vmax.f32 %v796_v58, %v797_v63  ;;  %v790_v7 = vmax.f32 %v788_v59, %v789_v0  ;;  %v802_v8 = vmax.f32 %v800_v60, %v801_v1  ;;  %v782_v9 = vmax.f32 %v773_v61, %v781_v2 }
 0x1ff   : > { %v812_v18 = vmax.f32 %v778_v62, %v811_v3  ;;  %v777_v19 = vadd.f32 %v772_v44, %v761_v4  ;;  %v780_v20 = vadd.f32 %v772_v44, %v770_v5 }
 0x200   : > { %v831_v21 = vsub.f32 %v775_v46, %v798_v6  ;;  %v791_v22 = vrot.slane %v790_v7, 1  ;;  %v803_v23 = vrot.slane %v802_v8, 1  ;;  %v783_v24 = vrot.slane %v782_v9, 2 }
 0x201   : > { %v813_v25 = vrot.slane %v812_v18, 2  ;;  %v805_v26 = vrot.slane %v777_v19, 4  ;;  %v823_v27 = vrot.slane %v780_v20, 4  ;;  %v767_v28 = vpop.xlane.xlu0 %766 }
 0x202   : > { %v841_v29 = vmul.f32 1.442695, %v831_v21  ;;  %v792_v30 = vmax.f32 %v790_v7, %v791_v22  ;;  %v804_v31 = vmax.f32 %v802_v8, %v803_v23  ;;  %v784_v32 = vmax.f32 %v782_v9, %v783_v24 }
 0x203   : > { %v814_v33 = vmax.f32 %v812_v18, %v813_v25  ;;  %v806_v34 = vmax.f32 %v777_v19, %v805_v26  ;;  %v824_v35 = vmax.f32 %v780_v20, %v823_v27  ;;  %v779_v36 = vadd.f32 %v772_v44, %v767_v28 }
 0x204   : > { %1313 = vpow2.f32 %v841_v29  ;;  %v830_v37 = vsub.f32 %v774_v51, %v792_v30  ;;  %v832_v38 = vsub.f32 %v776_v52, %v804_v31  ;;  %v785_v39 = vrot.slane %v784_v32, 1 }
 0x205   : > { %v815_v40 = vrot.slane %v814_v33, 1  ;;  %v807_v41 = vrot.slane %v806_v34, 2  ;;  %v825_v42 = vrot.slane %v824_v35, 2  ;;  %v817_v43 = vrot.slane %v779_v36, 4 }
 0x206   : > { %v839_v45 = vmul.f32 1.442695, %v830_v37  ;;  %v843_v46 = vmul.f32 1.442695, %v832_v38  ;;  %v786_v47 = vmax.f32 %v784_v32, %v785_v39 }
 0x207   : > { %v816_v48 = vmax.f32 %v814_v33, %v815_v40  ;;  %v808_v49 = vmax.f32 %v806_v34, %v807_v41  ;;  %v826_v50 = vmax.f32 %v824_v35, %v825_v42  ;;  %v818_v53 = vmax.f32 %v779_v36, %v817_v43 }
 0x208   : > { %1315 = vpow2.f32 %v839_v45  ;;  %v829_v54 = vsub.f32 %v773_v61, %v786_v47 }
 0x209   : > { %1317 = vpow2.f32 %v843_v46  ;;  %v834_v55 = vsub.f32 %v778_v62, %v816_v48  ;;  %v809_v44 = vrot.slane %v808_v49, 1  ;;  %v827_v56 = vrot.slane %v826_v50, 1 }
 0x20a   : > { %v837_v51 = vmul.f32 1.442695, %v829_v54  ;;  %v819_v52 = vrot.slane %v818_v53, 2 }
 0x20b   : > { %v847_v57 = vmul.f32 1.442695, %v834_v55  ;;  %v810_v58 = vmax.f32 %v808_v49, %v809_v44  ;;  %v828_v59 = vmax.f32 %v826_v50, %v827_v56 }
 0x20c   : > { %1319 = vpow2.f32 %v837_v51  ;;  %v820_v60 = vmax.f32 %v818_v53, %v819_v52 }
 0x20d   : > { %1321 = vpow2.f32 %v847_v57  ;;  %v833_v63 = vsub.f32 %v777_v19, %v810_v58  ;;  %v836_v0 = vsub.f32 %v780_v20, %v828_v59 }
 0x20e   : > { %v821_v1 = vrot.slane %v820_v60, 1 }
 0x20f   : > { %v845_v2 = vmul.f32 1.442695, %v833_v63  ;;  %v851_v3 = vmul.f32 1.442695, %v836_v0 }
 0x210   : > { %v822_v4 = vmax.f32 %v820_v60, %v821_v1 }
 0x211   : > { %v1848_v5 = vpop.eup %1313  ;;  %1323 = vpow2.f32 %v845_v2 }
 0x212   : > { %v865_v61 = vrot.slane %v1848_v5, 4  ;;  %1325 = vpow2.f32 %v851_v3  ;;  %v835_v62 = vsub.f32 %v779_v36, %v822_v4 }
 0x214   : > { %v866_v6 = vadd.f32 %v1848_v5, %v865_v61  ;;  %v849_v7 = vmul.f32 1.442695, %v835_v62 }
 0x215   : > { %v1852_v8 = vpop.eup %1315 }
 0x216   : > { %v1854_v9 = vpop.eup %1317  ;;  %v867_v18 = vrot.slane %v866_v6, 2  ;;  %v859_v19 = vrot.slane %v1852_v8, 4  ;;  %1327 = vpow2.f32 %v849_v7 }
 0x217   : > { %v871_v20 = vrot.slane %v1854_v9, 4 }
 0x218   : > { %v868_v21 = vadd.f32 %v867_v18, %v866_v6  ;;  %v860_v22 = vadd.f32 %v1852_v8, %v859_v19 }
 0x219   : > { %v1859_v23 = vpop.eup %1319  ;;  %v872_v24 = vadd.f32 %v1854_v9, %v871_v20 }
 0x21a   : > { %v1862_v25 = vpop.eup %1321  ;;  %v869_v26 = vrot.slane %v868_v21, 1  ;;  %v861_v27 = vrot.slane %v860_v22, 2  ;;  %v853_v28 = vrot.slane %v1859_v23, 4 }
 0x21b   : > { %v873_v29 = vrot.slane %v872_v24, 2  ;;  %v883_v30 = vrot.slane %v1862_v25, 4 }
 0x21c   : > { %v870_v31 = vadd.f32 %v869_v26, %v868_v21  ;;  %v862_v32 = vadd.f32 %v861_v27, %v860_v22  ;;  %v854_v33 = vadd.f32 %v1859_v23, %v853_v28 }
 0x21d   : > { %v874_v34 = vadd.f32 %v873_v29, %v872_v24  ;;  %v884_v35 = vadd.f32 %v1862_v25, %v883_v30 }
 0x21e   : > { %v1868_v36 = vpop.eup %1323  ;;  %1329 = vrcp.f32 %v870_v31  ;;  %v863_v37 = vrot.slane %v862_v32, 1  ;;  %v855_v38 = vrot.slane %v854_v33, 2 }
 0x21f   : > { %v1870_v39 = vpop.eup %1325  ;;  %v875_v40 = vrot.slane %v874_v34, 1  ;;  %v885_v41 = vrot.slane %v884_v35, 2  ;;  %v877_v42 = vrot.slane %v1868_v36, 4 }
 0x220   : > { %v864_v43 = vadd.f32 %v863_v37, %v862_v32  ;;  %v856_v45 = vadd.f32 %v855_v38, %v854_v33  ;;  %v895_v46 = vrot.slane %v1870_v39, 4 }
 0x221   : > { %v876_v47 = vadd.f32 %v875_v40, %v874_v34  ;;  %v886_v48 = vadd.f32 %v885_v41, %v884_v35  ;;  %v878_v49 = vadd.f32 %v1868_v36, %v877_v42 }
 0x222   : > { %1331 = vrcp.f32 %v864_v43  ;;  %v857_v50 = vrot.slane %v856_v45, 1  ;;  %v896_v53 = vadd.f32 %v1870_v39, %v895_v46 }
 0x223   : > { %v1876_v54 = vpop.eup %1327  ;;  %1333 = vrcp.f32 %v876_v47  ;;  %v887_v55 = vrot.slane %v886_v48, 1  ;;  %v879_v44 = vrot.slane %v878_v49, 2 }
 0x224   : > { %v858_v56 = vadd.f32 %v857_v50, %v856_v45  ;;  %v897_v51 = vrot.slane %v896_v53, 2  ;;  %v889_v52 = vrot.slane %v1876_v54, 4 }
 0x225   : > { %v888_v57 = vadd.f32 %v887_v55, %v886_v48  ;;  %v880_v58 = vadd.f32 %v879_v44, %v878_v49 }
 0x226   : > { %1335 = vrcp.f32 %v858_v56  ;;  %v898_v59 = vadd.f32 %v897_v51, %v896_v53  ;;  %v890_v60 = vadd.f32 %v1876_v54, %v889_v52 }
 0x227   : > { %v881_v63 = vrot.slane %v880_v58, 1  ;;  %1337 = vrcp.f32 %v888_v57 }
 0x228   : > { %v891_v0 = vrot.slane %v890_v60, 2  ;;  %v899_v1 = vrot.slane %v898_v59, 1 }
 0x229   : > { %v882_v2 = vadd.f32 %v881_v63, %v880_v58 }
 0x22a   : > { %v892_v3 = vadd.f32 %v891_v0, %v890_v60  ;;  %v900_v4 = vadd.f32 %v899_v1, %v898_v59 }
 0x22b   : > { %v1330_v61 = vpop.eup %1329  ;;  %1339 = vrcp.f32 %v882_v2 }
 0x22c   : > { %v893_v62 = vrot.slane %v892_v3, 1  ;;  %1341 = vrcp.f32 %v900_v4  ;;  %v911_v6 = vmul.f32 %v1330_v61, %v1848_v5 }
 0x22e   : > { %v894_v7 = vadd.f32 %v893_v62, %v892_v3  ;;  %v919_v18 = vmul.f32 %v911_v6, %v1791_v10 }
 0x22f   : > { %v1332_v19 = vpop.eup %1331 }
 0x230   : > { %v1334_v20 = vpop.eup %1333  ;;  %1343 = vrcp.f32 %v894_v7  ;;  %v910_v21 = vmul.f32 %v1332_v19, %v1852_v8  ;;  %v939_v22 = vsel %vm412_vm1, %v919_v18, 0.0 }
 0x231   : > { %v912_v24 = vmul.f32 %v1334_v20, %v1854_v9  ;;  %v940_v26 = vrot.slane %v939_v22, 4 }
 0x232   : > { %v918_v27 = vmul.f32 %v910_v21, %v1820_v16 }
 0x233   : > { %v1336_v28 = vpop.eup %1335  ;;  %v920_v29 = vmul.f32 %v912_v24, %v1794_v11  ;;  %v941_v31 = vadd.f32 %v940_v26, %v939_v22 }
 0x234   : > { %v1338_v30 = vpop.eup %1337  ;;  %v909_v5 = vmul.f32 %v1336_v28, %v1859_v23  ;;  %v932_v10 = vsel %vm412_vm1, %v918_v27, 0.0 }
 0x235   : > { %v914_v32 = vmul.f32 %v1338_v30, %v1862_v25  ;;  %v933_v33 = vrot.slane %v932_v10, 4  ;;  %v946_v8 = vsel %vm412_vm1, %v920_v29, 0.0  ;;  %v942_v38 = vrot.slane %v941_v31, 2 }
 0x236   : > { %v917_v34 = vmul.f32 %v909_v5, %v1803_v13  ;;  %v947_v9 = vrot.slane %v946_v8, 4 }
 0x237   : > { %v922_v35 = vmul.f32 %v914_v32, %v1810_v14  ;;  %v934_v16 = vadd.f32 %v933_v33, %v932_v10  ;;  %v943_v49 = vadd.f32 %v942_v38, %v941_v31 }
 0x238   : > { %v1340_v37 = vpop.eup %1339  ;;  %v925_v11 = vsel %vm412_vm1, %v917_v34, 0.0  ;;  %v948_v40 = vadd.f32 %v947_v9, %v946_v8 }
 0x239   : > { %v1342_v23 = vpop.eup %1341  ;;  %v913_v41 = vmul.f32 %v1340_v37, %v1868_v36  ;;  %v926_v42 = vrot.slane %v925_v11, 4  ;;  %v935_v43 = vrot.slane %v934_v16, 2  ;;  %v960_v46 = vsel %vm412_vm1, %v922_v35, 0.0 }
 0x23a   : > { %v916_v25 = vmul.f32 %v1342_v23, %v1870_v39  ;;  %v949_v45 = vrot.slane %v948_v40, 2  ;;  %v961_v50 = vrot.slane %v960_v46, 4  ;;  %v944_v59 = vrot.slane %v943_v49, 1 }
 0x23b   : > { %v921_v13 = vmul.f32 %v913_v41, %v1798_v12  ;;  %v927_v47 = vadd.f32 %v926_v42, %v925_v11  ;;  %v936_v14 = vadd.f32 %v935_v43, %v934_v16 }
 0x23c   : > { %v924_v48 = vmul.f32 %v916_v25, %v1825_v17  ;;  %v950_v56 = vadd.f32 %v949_v45, %v948_v40  ;;  %v962_v39 = vadd.f32 %v961_v50, %v960_v46  ;;  %v945_v7 = vadd.f32 %v944_v59, %v943_v49 }
 0x23d   : > { %v1344_v53 = vpop.eup %1343  ;;  %v928_v55 = vrot.slane %v927_v47, 2  ;;  %v953_v44 = vsel %vm412_vm1, %v921_v13, 0.0  ;;  %v937_v57 = vrot.slane %v936_v14, 1 }
 0x23e   : > { %v915_v36 = vmul.f32 %v1344_v53, %v1876_v54  ;;  %v954_v51 = vrot.slane %v953_v44, 4  ;;  %v974_v58 = vsel %vm412_vm1, %v924_v48, 0.0  ;;  %v963_v17 = vrot.slane %v962_v39, 2 }
 0x23f   : > { %v929_v52 = vadd.f32 %v928_v55, %v927_v47  ;;  %v975_v0 = vrot.slane %v974_v58, 4  ;;  %v951_v1 = vrot.slane %v950_v56, 1  ;;  %v938_v61 = vadd.f32 %v937_v57, %v936_v14 }
 0x240   : > { %v923_v12 = vmul.f32 %v915_v36, %v1815_v15  ;;  %v955_v60 = vadd.f32 %v954_v51, %v953_v44  ;;  %v964_v3 = vadd.f32 %v963_v17, %v962_v39 }
 0x241   : > { %v930_v63 = vrot.slane %v929_v52, 1  ;;  %v976_v6 = vadd.f32 %v975_v0, %v974_v58  ;;  %v952_v21 = vadd.f32 %v951_v1, %v950_v56 }
 0x242   : > { %v956_v2 = vrot.slane %v955_v60, 2  ;;  %v967_v54 = vsel %vm412_vm1, %v923_v12, 0.0  ;;  %v965_v24 = vrot.slane %v964_v3, 1 }
 0x243   : > { %v931_v4 = vadd.f32 %v930_v63, %v929_v52  ;;  %v968_v62 = vrot.slane %v967_v54, 4  ;;  %v977_v15 = vrot.slane %v976_v6, 2 }
 0x244   : > { %v957_v18 = vadd.f32 %v956_v2, %v955_v60  ;;  %v966_v31 = vadd.f32 %v965_v24, %v964_v3 }
 0x245   : > { %v969_v19 = vadd.f32 %v968_v62, %v967_v54  ;;  %v990_v20 = vsel %vm989_vm2, %v938_v61, %v931_v4  ;;  %v978_v28 = vadd.f32 %v977_v15, %v976_v6 }
 0x246   : > { %v958_v22 = vrot.slane %v957_v18, 1  ;;  %v992_v26 = vsel %vm991_vm3, %v945_v7, %v990_v20 }
 0x247   : > { %v970_v27 = vrot.slane %v969_v19, 2  ;;  %v994_v30 = vsel %vm993_vm4, %v952_v21, %v992_v26  ;;  %v979_v10 = vrot.slane %v978_v28, 1 }
 0x248   : > { %v959_v29 = vadd.f32 %v958_v22, %v957_v18 }
 0x249   : > { %v971_v5 = vadd.f32 %v970_v27, %v969_v19  ;;  %v980_v8 = vadd.f32 %v979_v10, %v978_v28 }
 0x24a   : > { %v996_v33 = vsel %vm995_vm5, %v959_v29, %v994_v30 }
 0x24b   : > { %v972_v32 = vrot.slane %v971_v5, 1  ;;  %v998_v9 = vsel %vm997_vm6, %v966_v31, %v996_v33 }
 0x24d   : > { %v973_v34 = vadd.f32 %v972_v32, %v971_v5 }
 0x24f   : > { %v1000_v35 = vsel %vm999_vm7, %v973_v34, %v998_v9 }
 0x250   : > { %v1002_v16 = vsel %vm1001_vm8, %v980_v8, %v1000_v35 }
 0x251   : > { %1004 = vst.msk [vmem:[%s390_s4] sm:$0xff] %vm412_vm1, %v1002_v16 }
 0x252   : > { %1466 = shalt.err (!%p1463_p4)
}
 0x253   : > { %s1467_s11 = scalar_lea.hbm %s1911_s19, 128  ;;  %s1471_s15 = scalar_lea.hbm %s1957_s8, 256 }
 0x254   : > { %p1468_p6 = scmp.ne.s32.totalorder %s1911_s19, %s1467_s11  ;;  %p1472_p2 = scmp.lt.s32.totalorder %s1911_s19, %s1957_s8 }
 0x255   : > { %p1473_p5 = scmp.lt.s32.totalorder %s1471_s15, %s1467_s11 }
 0x256   : > { %p1469_p7 = pnand %p1468_p6, %p1989_p10 }
 0x257   : > { %p1474_p12 = por %p1473_p5, %p1472_p2 }
 0x258   : > { %p1470_p8 = pneg %p1469_p7 }
 0x25a   : > { %p1475_p0 = pnand %p1474_p12, %p1470_p8 }
 0x25c   : > { %1478 = shalt.err (!%p1475_p0)
}
 0x25d   : > { %1232 = dma.vmem_to_hbm [thread:$0]  (%p1989_p10), %s1020_s24, 128, %s1911_s19, %s1006_s20  }
 0x25e PF: > { %s1031_s27 = sand.u32 1, %s1517_s29   ;;  %p1990_p3 = scmp.ne.s32.totalorder %s1970_s13, 0 }
 0x25f   : > { %p1991_p11 = scmp.ge.s32.totalorder %s1529_s10, 2  ;;  %s1032_s2 = scalar_lea.sflag [#allocation5], %s1031_s27 }
 0x261   : > { %p1249_p9 = pnand %p1991_p11, %p1990_p3 }
 0x263   : > { %p1250_p13 = pneg %p1249_p9 }
 0x265   : > { %1512 = dma.done.wait (%p1250_p13), %s1032_s2, 128  }
 0x266   : > { %1514 = vsyncadd (%p1250_p13), %s1032_s2, 4294967168  ;;  %s1992_s18 = sld [smem:[#allocation17_spill]]  ;;  %p26_p1 = scmp.ge.s32.totalorder %s1667_s28, 4  }
 0x267   : > { %s1993_s9 = sld [smem:[#allocation18_spill]]  ;;  %s1994_s29 = smov %s1521_s30 }
 0x268   : > { %s1996_s10 = smov %s1667_s28  ;;  %28 = sbr.rel (!%p26_p1) target bundleno = 13 (0xd), region = 118 }
 0x26c   : > { %s1995_s30 = smov %s1992_s18 }
 0x26d   :  { %1037 = vsyncpa [#allocation4], 1 }
 0x26e   :  { %1039 = vsyncpa [#allocation4 + $0x1], 1 }
 0x26f   :  { %1040 = vsyncpa [#allocation7], 1 }
 0x270   :  { %1042 = vsyncpa [#allocation7 + $0x1], 1 }
 0x271   :  { %1043 = vsyncpa [#allocation10], 1 }
 0x272   :  { %1044 = vsyncpa [#allocation5], 1 }
 0x273   :  { %1046 = vsyncpa [#allocation5 + $0x1], 1 }

</bundles_post_ra>
